<compile_context>
chip_gen: v7x
topology: tpu7x:2x2x1
jax: 0.10.0
libtpu: 0.0.40
codegen_flags: <defaults>
</compile_context>

<pallas_src>
import functools

import jax
import jax.numpy as jnp
from jax.experimental import pallas as pl
from jax.experimental.pallas import tpu as pltpu


def _head_kernel(x_ref, w_ref, b_ref, o_ref):
    # x_ref: (1, C_in, TP)   w_ref: (C_out, C_in)   b_ref: (C_out, 1)   o_ref: (1, C_out, TP)
    # K = C_in is tiny and the kernel is HBM-bound, so the contraction cost is
    # irrelevant — run it on the idle MXU (vector-extended slot) and accumulate in f32.
    acc = jnp.dot(w_ref[...], x_ref[0], preferred_element_type=jnp.float32)  # (C_out, TP)
    o_ref[0] = (acc + b_ref[...]).astype(o_ref.dtype)


def _choose_tile_p(p, n, max_tile_p):
    """Pick a lane tile that exactly divides P (no pad, no output slice).

    - If P is not a multiple of 128, use the full extent P as the block (allowed
      because the block dim equals the full array dim): output emitted at exactly P.
    - Otherwise choose the largest 128-multiple divisor of P that is <= max_tile_p,
      subject to producing at least 2 total 'parallel' grid iterations when N == 1
      (so v7x's two TensorCores both get work).
    """
    if p % 128 != 0:
        return p
    chunks = p // 128
    min_tiles = 1 if n >= 2 else 2
    for nt in range(1, chunks + 1):
        if chunks % nt == 0 and (chunks // nt) * 128 <= max_tile_p and nt >= min_tiles:
            return (chunks // nt) * 128
    # Tiny P: can't honour min_tiles; just take the fewest tiles that fit.
    for nt in range(1, chunks + 1):
        if chunks % nt == 0 and (chunks // nt) * 128 <= max_tile_p:
            return (chunks // nt) * 128
    return 128


@functools.partial(jax.jit, static_argnames=("max_tile_p",))
def detection_head_forward(x_nchw, weight, bias, max_tile_p=16384):
    """1x1 conv forward (== DetectionHead.forward).

    x_nchw : (N, C_in, H, W) float32
    weight : (C_out, C_in, 1, 1) float32   (PyTorch Conv2d layout)
    bias   : (C_out,) float32
    returns: (N, C_out, H, W) float32
    """
    n, c_in, h, w = x_nchw.shape
    c_out = weight.shape[0]
    p = h * w

    # Free reshapes -- no transposes, no padding, no post-slice.
    x_mat = x_nchw.reshape(n, c_in, p)      # (N, C_in, P), pixels on the lane axis
    w_mat = weight.reshape(c_out, c_in)     # (C_out, C_in), tiny resident tile
    b_mat = bias.reshape(c_out, 1)          # (C_out, 1) -> lane-broadcast add in kernel

    tile_p = _choose_tile_p(p, n, max_tile_p)
    grid = (n, p // tile_p)                 # exact by construction

    out = pl.pallas_call(
        _head_kernel,
        out_shape=jax.ShapeDtypeStruct((n, c_out, p), x_nchw.dtype),
        grid=grid,
        in_specs=[
            # Per-(batch, pixel-tile) input block, pixels on lanes.
            pl.BlockSpec((1, c_in, tile_p), lambda b, i: (b, 0, i)),
            # Tiny weight / bias stay resident across the whole grid.
            pl.BlockSpec((c_out, c_in), lambda b, i: (0, 0)),
            pl.BlockSpec((c_out, 1), lambda b, i: (0, 0)),
        ],
        out_specs=pl.BlockSpec((1, c_out, tile_p), lambda b, i: (b, 0, i)),
        compiler_params=pltpu.CompilerParams(
            # Each output block is written exactly once -> both axes can be parallel
            # (v7x shards them across its two TensorCores; harmless on v5e/v6e).
            dimension_semantics=("parallel", "parallel"),
            # Explicit scoped-VMEM budget; with 16K-lane tiles the double-buffered
            # blocks need only a few MiB, so 32 MiB is ample on every generation.
            vmem_limit_bytes=32 * 1024 * 1024,
        ),
    )(x_mat, w_mat, b_mat)

    return out.reshape(n, c_out, h, w)


def _reference(x, weight, bias):
    c_out, c_in = weight.shape[0], weight.shape[1]
    return (
        jnp.einsum("nchw,oc->nohw", x, weight.reshape(c_out, c_in))
        + bias[None, :, None, None]
    )


if __name__ == "__main__":
    # Small shapes consistent with the module.
    batch = 2
    in_channels = 4
    spatial = 16
    num_classes = 3
    num_anchors = 3
    out_channels = num_anchors * (4 + 1 + num_classes)  # 24

    key = jax.random.PRNGKey(0)
    kx, kw, kb = jax.random.split(key, 3)

    x = jax.random.normal(kx, (batch, in_channels, spatial, spatial), dtype=jnp.float32)
    # PyTorch Conv2d weight layout: (C_out, C_in, 1, 1).
    weight = jax.random.normal(kw, (out_channels, in_channels, 1, 1), dtype=jnp.float32) * 0.1
    bias = jax.random.normal(kb, (out_channels,), dtype=jnp.float32) * 0.1

    out = detection_head_forward(x, weight, bias)
    out = jax.block_until_ready(out)
    ref = _reference(x, weight, bias)
    assert out.shape == (batch, out_channels, spatial, spatial)
    assert jnp.allclose(out, ref, atol=1e-4, rtol=1e-4)

    # Also exercise the ragged path (P not a multiple of 128 -> full-extent pixel block,
    # still no padding and no output slice).
    x2 = jax.random.normal(kx, (batch, in_channels, 20, 20), dtype=jnp.float32)
    out2 = jax.block_until_ready(detection_head_forward(x2, weight, bias))
    ref2 = _reference(x2, weight, bias)
    assert jnp.allclose(out2, ref2, atol=1e-4, rtol=1e-4)

    print("KERNEL_OK")
</pallas_src>

<mosaic_0001>
module attributes {stable_mosaic.version = 11 : i64} {
  func.func @_head_kernel(%arg0: i32, %arg1: i32, %arg2: memref<1x4x256xf32, #tpu.memory_space<vmem>>, %arg3: memref<24x4xf32, #tpu.memory_space<vmem>>, %arg4: memref<24x1xf32, #tpu.memory_space<vmem>>, %arg5: memref<1x24x256xf32, #tpu.memory_space<vmem>>) attributes {dimension_semantics = [#tpu.dimension_semantics<parallel>, #tpu.dimension_semantics<parallel>], iteration_bounds = array<i64: 2, 1>, scalar_prefetch = 0 : i64, scratch_operands = 0 : i64, tpu.core_type = #tpu.core_type<tc>, window_params = [{transform_indices = @transform_0, window_bounds = array<i64: 1, 4, 256>}, {pipeline_mode = #tpu.pipeline_mode<synchronous>, transform_indices = @transform_1, window_bounds = array<i64: 24, 4>}, {pipeline_mode = #tpu.pipeline_mode<synchronous>, transform_indices = @transform_2, window_bounds = array<i64: 24, 1>}, {transform_indices = @transform_3, window_bounds = array<i64: 1, 24, 256>}]} {
    %c0 = arith.constant 0 : index
    %c0_0 = arith.constant 0 : index
    %0 = vector.load %arg3[%c0, %c0_0] : memref<24x4xf32, #tpu.memory_space<vmem>>, vector<24x4xf32>
    %c0_1 = arith.constant 0 : index
    %c0_2 = arith.constant 0 : index
    %c0_3 = arith.constant 0 : index
    %1 = vector.load %arg2[%c0_1, %c0_2, %c0_3] : memref<1x4x256xf32, #tpu.memory_space<vmem>>, vector<1x4x256xf32>
    %2 = vector.shape_cast %1 : vector<1x4x256xf32> to vector<4x256xf32>
    %cst = arith.constant dense<0.000000e+00> : vector<24x256xf32>
    %3 = tpu.matmul %0, %2, %cst {dimension_numbers = #tpu.dot_dimension_numbers<[1], [0], [0], [1], [0, 0, 1, 1], [], []>} : vector<24x4xf32>, vector<4x256xf32>, vector<24x256xf32> -> vector<24x256xf32>
    %c0_4 = arith.constant 0 : index
    %c0_5 = arith.constant 0 : index
    %4 = vector.load %arg4[%c0_4, %c0_5] : memref<24x1xf32, #tpu.memory_space<vmem>>, vector<24x1xf32>
    %5 = vector.broadcast %4 : vector<24x1xf32> to vector<24x256xf32>
    %6 = arith.addf %3, %5 : vector<24x256xf32>
    %c0_6 = arith.constant 0 : index
    %c0_7 = arith.constant 0 : index
    %c0_8 = arith.constant 0 : index
    %7 = vector.load %arg5[%c0_6, %c0_7, %c0_8] : memref<1x24x256xf32, #tpu.memory_space<vmem>>, vector<1x24x256xf32>
    %8 = vector.shape_cast %7 : vector<1x24x256xf32> to vector<24x256xf32>
    %9 = vector.shape_cast %6 : vector<24x256xf32> to vector<1x24x256xf32>
    tpu.vector_store %arg5[%c0_6, %c0_7, %c0_8], %9 {strides = array<i32>} : memref<1x24x256xf32, #tpu.memory_space<vmem>>, vector<1x24x256xf32>,
    return
  }
  func.func @transform_0(%arg0: i32, %arg1: i32) -> (i32, i32, i32) {
    %c0_i32 = arith.constant 0 : i32
    %c0_i32_0 = arith.constant 0 : i32
    return %arg0, %c0_i32, %arg1 : i32, i32, i32
  }
  func.func @transform_1(%arg0: i32, %arg1: i32) -> (i32, i32) {
    %c0_i32 = arith.constant 0 : i32
    %c0_i32_0 = arith.constant 0 : i32
    %c0_i32_1 = arith.constant 0 : i32
    return %c0_i32, %c0_i32_0 : i32, i32
  }
  func.func @transform_2(%arg0: i32, %arg1: i32) -> (i32, i32) {
    %c0_i32 = arith.constant 0 : i32
    %c0_i32_0 = arith.constant 0 : i32
    %c0_i32_1 = arith.constant 0 : i32
    return %c0_i32, %c0_i32_0 : i32, i32
  }
  func.func @transform_3(%arg0: i32, %arg1: i32) -> (i32, i32, i32) {
    %c0_i32 = arith.constant 0 : i32
    %c0_i32_0 = arith.constant 0 : i32
    return %arg0, %c0_i32, %arg1 : i32, i32, i32
  }
}

</mosaic_0001>

<bundles_post_ra>
// kernel: detection_head_forward.1
= control target key start
LH: loop header
LB: loop body
LE: loop exit
PB: predicated region body
PF: predicated region fallthrough
CT: control target
= control target key end

     0   :  { %s519_s12 = smov 0   ;;  %s521_s13 = smov 0   ;;  %s574_s0 = inlined_call_operand.vmem [shape: f32[2,4,256], index: 0, kind: input, shape index: {}]   ;;  %s575_s1 = inlined_call_operand.vmem [shape: f32[24,4], index: 1, kind: input, shape index: {}]   ;;  %s576_s2 = inlined_call_operand.vmem [shape: f32[24,1], index: 2, kind: input, shape index: {}]   ;;  %s577_s3 = inlined_call_operand.vmem [shape: f32[2,24,256], index: 3, kind: output, shape index: {}]  }
   0x1   :  { %s523_s14 = smov 0  }
   0x2 LB: > { %s25_s15 = sadd.s32 1, %s491_s13  ;;  %p429_p0 = scmp.ge.s32.totalorder %s495_s14, 1  ;;  %s495_s14 = sphi %s523_s14, %s13_s14   ;;  %s491_s13 = sphi %s521_s13, %s579_s13   ;;  %s487_s12 = sphi %s519_s12, %s578_s12  }
   0x3   : > { %p27_p1 = scmp.ge.s32.totalorder %s25_s15, 2  ;;  %p158_p2 = scmp.lt.s32.totalorder %s495_s14, 3 }
   0x5   : > { %s581_s15 = smov (%p27_p1, %s25_s15), 0  ;;  %p159_p3 = pnand %p429_p0, %p158_p2 }
   0x6   : > { %p191_p4 = scmp.lt.s32.totalorder (!%p159_p3), %s487_s12, 1  ;;  %v497_v0 = vmov (!%p159_p3), 0.0   ;;  %v214_v1 = vld [vmem:[%s576_s2] sm:$0xff] (!%p159_p3)  ;;  %v498_v2 = vmov (!%p159_p3), 0   ;;  %v216_v3 = vld [vmem:[%s576_s2 + $0x10] sm:$0xff] (!%p159_p3)  ;;  %v215_v4 = vld [vmem:[%s576_s2 + $0x8] sm:$0xff] (!%p159_p3) }
   0x7   : > { %162 = sbr.rel (%p159_p3) target bundleno = 242 (0xf2), region = 32  ;;  %313 = vmatprep.mubr.f32.mxu0 (!%p159_p3), %v497_v0  ;;  %319 = vmatprep.mubr.f32.mxu1 (!%p159_p3), %v497_v0  ;;  %vm244_vm0 = vcmask (!%p159_p3), 1043456   ;;  %v210_v7 = vld [vmem:[%s575_s1] sm:$0xff] (!%p159_p3)  ;;  %vm234_vm1 = vcmask (!%p159_p3), 31744   ;;  %v211_v8 = vld [vmem:[%s575_s1 + $0x8] sm:$0xff] (!%p159_p3)  ;;  %v212_v9 = vld [vmem:[%s575_s1 + $0x10] sm:$0xff] (!%p159_p3) }
   0x8   : > { %470 = vset.pattern.permute.xlu0 (!%p159_p3), %v498_v2  ;;  %471 = vset.pattern.permute.xlu1 (!%p159_p3), %v498_v2 }
   0x9   : > { %219 = vperm.xlu0 (!%p159_p3), %470, %v214_v1   ;;  %229 = vperm.xlu1 (!%p159_p3), %471, %v216_v3  }
   0xd   : > { %224 = vperm.xlu0 (!%p159_p3), %470, %v215_v4  }
   0xe   : > { %s583_s12 = smov (!%p191_p4, %s487_s12), 1 }
   0xf   : > { %s440_s20 = sshll.u32 %s583_s12, 3  ;;  %s443_s5 = smul.u32 48, %s583_s12 }
  0x10   : > { %s198_s25 = scalar_lea.vmem %s574_s0, %s440_s20 }
  0x11   : > { %v213_v5 = vld [vmem:[%s198_s25] sm:$0xff]  ;;  %s208_s8 = scalar_lea.vmem %s577_s3, %s443_s5 }
  0x12   : > { %v233_v6 = vcombine.high %v213_v5, %v213_v5 }
  0x14   : > { %433 = vmatprep.subr.msk.mxu0 %vm244_vm0, %v233_v6  ;;  %441 = vmatprep.subr.msk.mxu1 %vm244_vm0, %v233_v6 }
  0x15   : > { %434 = vmatpush1.msk.msra.mxu0 %vm244_vm0, %v213_v5  ;;  %442 = vmatpush1.msk.msra.mxu1 %vm244_vm0, %v213_v5 }
  0x16   : > { %435 = vmatmul.mubr.msk.f32.vlgmr.msra.gmra.mrb[0].mxu0 %vm234_vm1, %v210_v7  ;;  %436 = vmatmul.mubr.msk.f32.vlgmr.msra.gmra.mrb[0].mxu1 %vm234_vm1, %v211_v8 }
  0x17   : > { %325 = vmatprep.mubr.f32.mxu1 %v497_v0 }
  0x1a   : > { %437 = vmatmul.mubr.msk.f32.gmra.mrb[2].mxu1 %vm234_vm1, %v212_v9 }
  0x88   : > { %v220_v10 = vpop.permute.xlu0 %219  ;;  %v230_v20 = vpop.permute.xlu1 %229 }
  0x8c   : > { %v225_v11 = vpop.permute.xlu0 %224 }
  0xe9   : > { %v315_v12 = vpop.f32.mrb[0].mxu0  ;;  %v321_v13 = vpop.f32.mrb[0].mxu1 }
  0xea   : > { %v316_v14 = vadd.f32 %v315_v12, %v220_v10  ;;  %v322_v15 = vadd.f32 %v321_v13, %v225_v11  ;;  %v317_v16 = vpop.f32.mrb[1].mxu0  ;;  %v323_v17 = vpop.f32.mrb[1].mxu1 }
  0xeb   : > { %v318_v18 = vadd.f32 %v317_v16, %v220_v10  ;;  %v324_v19 = vadd.f32 %v323_v17, %v225_v11 }
  0xec   : > { %332 = vst [vmem:[%s208_s8] sm:$0xff] %v316_v14  ;;  %334 = vst [vmem:[%s208_s8 + $0x10] sm:$0xff] %v322_v15 }
  0xed   : > { %333 = vst [vmem:[%s208_s8 + $0x8] sm:$0xff] %v318_v18  ;;  %335 = vst [vmem:[%s208_s8 + $0x18] sm:$0xff] %v324_v19  ;;  %v327_v21 = vpop.f32.mrb[2].mxu1 }
  0xee   : > { %v328_v22 = vadd.f32 %v327_v21, %v230_v20  ;;  %v329_v23 = vpop.f32.mrb[3].mxu1 }
  0xef   : > { %v330_v24 = vadd.f32 %v329_v23, %v230_v20 }
  0xf0   : > { %336 = vst [vmem:[%s208_s8 + $0x20] sm:$0xff] %v328_v22 }
  0xf1   : > { %337 = vst [vmem:[%s208_s8 + $0x28] sm:$0xff] %v330_v24 }
  0xf2 PF: > { %s13_s14 = sadd.s32 1, %s495_s14   ;;  %s578_s12 = smov %s491_s13 }
  0xf3   : > { %p10_p5 = scmp.ge.s32.totalorder %s13_s14, 4   ;;  %s579_s13 = smov %s581_s15 }
  0xf5   :  { %12 = sbr.rel (!%p10_p5) target bundleno = 2 (0x2), region = 62 }

</bundles_post_ra>
